<compile_context>
chip_gen: v7x
topology: tpu7x:2x2x1
jax: 0.10.0
libtpu: 0.0.40
codegen_flags: <defaults>
</compile_context>

<pallas_src>
import functools

import jax
import jax.numpy as jnp
from jax.experimental import pallas as pl
from jax.experimental.pallas import tpu as pltpu


_MAX_TB = 256   # Batch tile: small enough that the grid has many steps
                # (v7x megacore + pipelining) and padding waste is <= 255 rows.
_TB_ALIGN = 16  # bf16 packs two rows per sublane -> keep tiles 16-row aligned.


def _round_up(x, m):
    return ((x + m - 1) // m) * m


def _mlp_kernel(x_ref, w1_ref, b1_ref, w2_ref, b2_ref, o_ref):
    # x:  (TB, IN)   f32  (streamed; cast to bf16 on the VPU, hidden under DMA)
    # w1: (IN, H)    bf16 (resident across grid)
    # b1: (1, H)     f32  (resident)
    # w2: (H, OUT)   bf16 (resident)
    # b2: (1, OUT)   f32  (resident)
    # o:  (TB, OUT)  f32  (compact store, OUT == full last dim)
    x = x_ref[...].astype(jnp.bfloat16)
    h = jnp.dot(x, w1_ref[...], preferred_element_type=jnp.float32)
    h = jnp.maximum(h + b1_ref[...], 0.0)            # f32 epilogue (v5e-safe)
    o = jnp.dot(h.astype(jnp.bfloat16), w2_ref[...],
                preferred_element_type=jnp.float32)
    o_ref[...] = (o + b2_ref[...]).astype(o_ref.dtype)


def prepare_qnet_params(w1, b1, w2, b2):
    """One-time parameter preparation (hoisted out of the forward hot path).

    w1: (hidden, in)  PyTorch layout. b1: (hidden,).
    w2: (out, hidden).                b2: (out,).

    Returns kernel-ready params: transposed (in, out)-layout bf16 weights and
    f32 row biases. No lane padding of the output dim (compact output).
    """
    w1 = jnp.asarray(w1)
    b1 = jnp.asarray(b1)
    w2 = jnp.asarray(w2)
    b2 = jnp.asarray(b2)

    hidden = w1.shape[0]
    out_dim = w2.shape[0]

    return {
        "w1_t": w1.T.astype(jnp.bfloat16),                   # (in, hidden)
        "b1_r": b1.reshape(1, hidden).astype(jnp.float32),   # (1, hidden)
        "w2_t": w2.T.astype(jnp.bfloat16),                   # (hidden, out)
        "b2_r": b2.reshape(1, out_dim).astype(jnp.float32),  # (1, out)
    }


@jax.jit
def _forward_impl(x, w1_t, b1_r, w2_t, b2_r):
    B, in_dim = x.shape
    hidden = w1_t.shape[1]
    out_dim = w2_t.shape[1]

    # Fixed-ish batch tile: multiple of 16 (bf16 sublane packing), capped so
    # the grid has many steps; padding waste is at most tb - 1 rows.
    tb = min(_MAX_TB, _round_up(B, _TB_ALIGN))
    b_pad = _round_up(B, tb)

    x_p = x
    if b_pad != B:
        x_p = jnp.pad(x_p, ((0, b_pad - B), (0, 0)))

    grid = (b_pad // tb,)

    out_padded = pl.pallas_call(
        _mlp_kernel,
        out_shape=jax.ShapeDtypeStruct((b_pad, out_dim), jnp.float32),
        grid=grid,
        in_specs=[
            pl.BlockSpec((tb, in_dim), lambda i: (i, 0)),       # x: streamed
            pl.BlockSpec((in_dim, hidden), lambda i: (0, 0)),   # W1: resident
            pl.BlockSpec((1, hidden), lambda i: (0, 0)),        # b1: resident
            pl.BlockSpec((hidden, out_dim), lambda i: (0, 0)),  # W2: resident
            pl.BlockSpec((1, out_dim), lambda i: (0, 0)),       # b2: resident
        ],
        out_specs=pl.BlockSpec((tb, out_dim), lambda i: (i, 0)),
        compiler_params=pltpu.CompilerParams(
            dimension_semantics=("parallel",),   # shard batch tiles across TCs
        ),
    )(x_p, w1_t, b1_r, w2_t, b2_r)

    return out_padded[:B].astype(x.dtype)


def linear_qnet_forward(x, params):
    """x: (B, input_size). params: output of prepare_qnet_params."""
    return _forward_impl(x, params["w1_t"], params["b1_r"],
                         params["w2_t"], params["b2_r"])


def init_linear_params(key, in_features, out_features, dtype=jnp.float32):
    """PyTorch nn.Linear default init: U(-1/sqrt(in), 1/sqrt(in))."""
    kw, kb = jax.random.split(key)
    bound = 1.0 / (in_features ** 0.5)
    w = jax.random.uniform(kw, (out_features, in_features), dtype, -bound, bound)
    b = jax.random.uniform(kb, (out_features,), dtype, -bound, bound)
    return w, b


if __name__ == "__main__":
    # Small shapes consistent with the module (snake Q-net style): 11 -> 32 -> 3.
    batch, input_size, hidden_size, output_size = 2, 11, 32, 3

    key = jax.random.PRNGKey(0)
    kx, k1, k2 = jax.random.split(key, 3)

    x = jax.random.normal(kx, (batch, input_size), jnp.float32)
    w1, b1 = init_linear_params(k1, input_size, hidden_size)
    w2, b2 = init_linear_params(k2, hidden_size, output_size)

    # One-time parameter prep (transpose + bf16 cast), outside the hot path.
    params = prepare_qnet_params(w1, b1, w2, b2)

    out = linear_qnet_forward(x, params)
    out = jax.block_until_ready(out)

    # Reference check (pure JAX, f32). Kernel uses bf16 MXU inputs with f32
    # accumulation, so compare with a bf16-appropriate tolerance.
    ref = jnp.maximum(x @ w1.T + b1, 0.0) @ w2.T + b2
    assert out.shape == (batch, output_size)
    assert jnp.allclose(out, ref, atol=5e-2, rtol=5e-2), (out, ref)

    # TODO(synk): Linear_QNet.save (torch.save to ./model) is file I/O, not part
    # of the forward pass, and is intentionally not implemented.

    print("KERNEL_OK")
</pallas_src>

<mosaic_0001>
module attributes {stable_mosaic.version = 11 : i64} {
  func.func @_mlp_kernel(%arg0: i32, %arg1: memref<16x11xf32, #tpu.memory_space<vmem>>, %arg2: memref<11x32xbf16, #tpu.memory_space<vmem>>, %arg3: memref<1x32xf32, #tpu.memory_space<vmem>>, %arg4: memref<32x3xbf16, #tpu.memory_space<vmem>>, %arg5: memref<1x3xf32, #tpu.memory_space<vmem>>, %arg6: memref<16x3xf32, #tpu.memory_space<vmem>>) attributes {dimension_semantics = [#tpu.dimension_semantics<parallel>], iteration_bounds = array<i64: 1>, scalar_prefetch = 0 : i64, scratch_operands = 0 : i64, tpu.core_type = #tpu.core_type<tc>, window_params = [{transform_indices = @transform_0, window_bounds = array<i64: 16, 11>}, {pipeline_mode = #tpu.pipeline_mode<synchronous>, transform_indices = @transform_1, window_bounds = array<i64: 11, 32>}, {pipeline_mode = #tpu.pipeline_mode<synchronous>, transform_indices = @transform_2, window_bounds = array<i64: 1, 32>}, {pipeline_mode = #tpu.pipeline_mode<synchronous>, transform_indices = @transform_3, window_bounds = array<i64: 32, 3>}, {pipeline_mode = #tpu.pipeline_mode<synchronous>, transform_indices = @transform_4, window_bounds = array<i64: 1, 3>}, {transform_indices = @transform_5, window_bounds = array<i64: 16, 3>}]} {
    %c0 = arith.constant 0 : index
    %c0_0 = arith.constant 0 : index
    %0 = vector.load %arg1[%c0, %c0_0] : memref<16x11xf32, #tpu.memory_space<vmem>>, vector<16x11xf32>
    %1 = arith.truncf %0 : vector<16x11xf32> to vector<16x11xbf16>
    %c0_1 = arith.constant 0 : index
    %c0_2 = arith.constant 0 : index
    %2 = vector.load %arg2[%c0_1, %c0_2] : memref<11x32xbf16, #tpu.memory_space<vmem>>, vector<11x32xbf16>
    %cst = arith.constant dense<0.000000e+00> : vector<16x32xf32>
    %3 = tpu.matmul %1, %2, %cst {dimension_numbers = #tpu.dot_dimension_numbers<[1], [0], [0], [1], [0, 0, 1, 1], [], []>} : vector<16x11xbf16>, vector<11x32xbf16>, vector<16x32xf32> -> vector<16x32xf32>
    %c0_3 = arith.constant 0 : index
    %c0_4 = arith.constant 0 : index
    %4 = vector.load %arg3[%c0_3, %c0_4] : memref<1x32xf32, #tpu.memory_space<vmem>>, vector<1x32xf32>
    %5 = vector.broadcast %4 : vector<1x32xf32> to vector<16x32xf32>
    %6 = arith.addf %3, %5 : vector<16x32xf32>
    %cst_5 = arith.constant 0.000000e+00 : f32
    %7 = vector.broadcast %cst_5 : f32 to vector<16x32xf32>
    %8 = arith.maximumf %6, %7 : vector<16x32xf32>
    %9 = arith.truncf %8 : vector<16x32xf32> to vector<16x32xbf16>
    %c0_6 = arith.constant 0 : index
    %c0_7 = arith.constant 0 : index
    %10 = vector.load %arg4[%c0_6, %c0_7] : memref<32x3xbf16, #tpu.memory_space<vmem>>, vector<32x3xbf16>
    %cst_8 = arith.constant dense<0.000000e+00> : vector<16x3xf32>
    %11 = tpu.matmul %9, %10, %cst_8 {dimension_numbers = #tpu.dot_dimension_numbers<[1], [0], [0], [1], [0, 0, 1, 1], [], []>} : vector<16x32xbf16>, vector<32x3xbf16>, vector<16x3xf32> -> vector<16x3xf32>
    %c0_9 = arith.constant 0 : index
    %c0_10 = arith.constant 0 : index
    %12 = vector.load %arg5[%c0_9, %c0_10] : memref<1x3xf32, #tpu.memory_space<vmem>>, vector<1x3xf32>
    %13 = vector.broadcast %12 : vector<1x3xf32> to vector<16x3xf32>
    %14 = arith.addf %11, %13 : vector<16x3xf32>
    %c0_11 = arith.constant 0 : index
    %c0_12 = arith.constant 0 : index
    %15 = vector.load %arg6[%c0_11, %c0_12] : memref<16x3xf32, #tpu.memory_space<vmem>>, vector<16x3xf32>
    tpu.vector_store %arg6[%c0_11, %c0_12], %14 {strides = array<i32>} : memref<16x3xf32, #tpu.memory_space<vmem>>, vector<16x3xf32>,
    return
  }
  func.func @transform_0(%arg0: i32) -> (i32, i32) {
    %c0_i32 = arith.constant 0 : i32
    %c0_i32_0 = arith.constant 0 : i32
    return %arg0, %c0_i32 : i32, i32
  }
  func.func @transform_1(%arg0: i32) -> (i32, i32) {
    %c0_i32 = arith.constant 0 : i32
    %c0_i32_0 = arith.constant 0 : i32
    %c0_i32_1 = arith.constant 0 : i32
    return %c0_i32, %c0_i32_0 : i32, i32
  }
  func.func @transform_2(%arg0: i32) -> (i32, i32) {
    %c0_i32 = arith.constant 0 : i32
    %c0_i32_0 = arith.constant 0 : i32
    %c0_i32_1 = arith.constant 0 : i32
    return %c0_i32, %c0_i32_0 : i32, i32
  }
  func.func @transform_3(%arg0: i32) -> (i32, i32) {
    %c0_i32 = arith.constant 0 : i32
    %c0_i32_0 = arith.constant 0 : i32
    %c0_i32_1 = arith.constant 0 : i32
    return %c0_i32, %c0_i32_0 : i32, i32
  }
  func.func @transform_4(%arg0: i32) -> (i32, i32) {
    %c0_i32 = arith.constant 0 : i32
    %c0_i32_0 = arith.constant 0 : i32
    %c0_i32_1 = arith.constant 0 : i32
    return %c0_i32, %c0_i32_0 : i32, i32
  }
  func.func @transform_5(%arg0: i32) -> (i32, i32) {
    %c0_i32 = arith.constant 0 : i32
    %c0_i32_0 = arith.constant 0 : i32
    return %arg0, %c0_i32 : i32, i32
  }
}

</mosaic_0001>

<bundles_post_ra>
// kernel: _forward_impl.1
= control target key start
LH: loop header
LB: loop body
LE: loop exit
PB: predicated region body
PF: predicated region fallthrough
CT: control target
= control target key end

     0   :  { %vm42_vm0 = vcmask 1044480   ;;  %vm43_vm1 = vcmask 1045504   ;;  %v200_v0 = vmov 0.0   ;;  %v201_v2 = vmov 65535   ;;  %s260_s1 = inlined_call_operand.vmem [shape: bf16[11,32], index: 1, kind: input, shape index: {}]   ;;  %s261_s0 = inlined_call_operand.vmem [shape: f32[16,11], index: 0, kind: input, shape index: {}]   ;;  %s262_s3 = inlined_call_operand.vmem [shape: bf16[32,3], index: 3, kind: input, shape index: {}]   ;;  %s263_s2 = inlined_call_operand.vmem [shape: f32[1,32], index: 2, kind: input, shape index: {}]   ;;  %s264_s4 = inlined_call_operand.vmem [shape: f32[1,3], index: 4, kind: input, shape index: {}]   ;;  %s265_s5 = inlined_call_operand.vmem [shape: f32[16,3], index: 5, kind: output, shape index: {}]  }
   0x1   :  { %180 = vmatprep.subr.bf16.mxu0 %v200_v0  ;;  %v197_v1 = vld [vmem:[%s260_s1] sm:$0x3f]   ;;  %186 = vmatprep.subr.bf16.mxu1 %v200_v0  ;;  %v44_v3 = vsel %vm42_vm0, 4294967295, %v201_v2  ;;  %v22_v5 = vld [vmem:[%s261_s0 + $0x8] sm:$0xff]  ;;  %vm202_vm2 = vmmov 0   ;;  %vm38_vm3 = vcmask 89088  }
   0x2   :  { %v21_v4 = vld [vmem:[%s261_s0] sm:$0xff]  ;;  %v45_v6 = vsel %vm43_vm1, %v44_v3, 0  ;;  %182 = vmatprep.mubr.msk.bf16.mxu0 %vm202_vm2, %v200_v0  ;;  %190 = vmatprep.mubr.msk.bf16.mxu1 %vm202_vm2, %v200_v0  ;;  %v199_v10 = vld [vmem:[%s262_s3 + $0x8] sm:$0xff]   ;;  %vm116_vm4 = vcmask 261120   ;;  %vm161_vm5 = vcmask 23552  }
   0x3   :  { %v47_v7 = vand.u32 %v197_v1, %v45_v6  ;;  %v23_v8 = vpack.c.bf16 %v22_v5, %v21_v4  ;;  %v198_v9 = vld [vmem:[%s262_s3] sm:$0xff]  }
   0x4   :  { %187 = vmatpush3.bf16.msra.mxu1 %v198_v9  ;;  %v168_v11 = vld [vmem:[%s263_s2] ss:$0 sm:$0xff] }
   0x5   :  { %181 = vmatpush3.bf16.msra.mxu0 %v47_v7  ;;  %188 = vmatprep.subr.bf16.mxu1 %v200_v0  ;;  %v171_v21 = vld [vmem:[%s264_s4] ss:$0 sm:$0xff] }
   0x8   :  { %183 = vmatmul.mubr.msk.bf16.vlgmr.msra.gmra.mrb[0].mxu0 %vm38_vm3, %v23_v8  ;;  %189 = vmatpush3.bf16.msra.mxu1 %v199_v10 }
  0xdb   :  { %v83_v12 = vpop.f32.mrb[0].mxu0 }
  0xdc   :  { %v84_v13 = vadd.f32 %v168_v11, %v83_v12  ;;  %v184_v14 = vpop.f32.mrb[1].mxu0 }
  0xdd   :  { %v86_v15 = vpop.f32.mrb[2].mxu0 }
  0xde   :  { %v87_v16 = vadd.f32 %v168_v11, %v86_v15  ;;  %v185_v17 = vpop.f32.mrb[3].mxu0  ;;  %v90_v18 = vmax.f32 %v84_v13, 0.0 }
  0xe0   :  { %v91_v19 = vmax.f32 %v87_v16, 0.0 }
  0xe2   :  { %v92_v20 = vpack.c.bf16 %v91_v19, %v90_v18 }
  0xe4   :  { %191 = vmatmul.mubr.msk.bf16.vlgmr.msra.gmra.mrb[0].mxu1 %vm116_vm4, %v92_v20 }
 0x1b7   :  { %v154_v22 = vpop.f32.mrb[0].mxu1 }
 0x1b8   :  { %v155_v23 = vadd.f32 %v171_v21, %v154_v22  ;;  %v192_v24 = vpop.f32.mrb[1].mxu1 }
 0x1b9   :  { %v157_v25 = vpop.f32.mrb[2].mxu1 }
 0x1ba   :  { %162 = vst.msk [vmem:[%s265_s5] sm:$0xff] %vm161_vm5, %v155_v23  ;;  %v158_v26 = vadd.f32 %v171_v21, %v157_v25  ;;  %v193_v27 = vpop.f32.mrb[3].mxu1 }
 0x1bc   :  { %163 = vst.msk [vmem:[%s265_s5 + $0x8] sm:$0xff] %vm161_vm5, %v158_v26 }

</bundles_post_ra>
